<compile_context>
chip_gen: v6e
topology: v6e:2x2x1
jax: 0.10.0
libtpu: 0.0.40
codegen_flags: <defaults>
</compile_context>

<pallas_src>
import functools
import math

import jax
import jax.numpy as jnp
from jax.experimental import pallas as pl
from jax.experimental.pallas import tpu as pltpu


# ----------------------------- fused Pallas kernel ---------------------------

def _vae_fused_kernel(x_ref, eps_ref, *refs, n_enc, n_dec, topic_num):
    """Whole VAE forward in one kernel.

    refs layout (after x_ref, eps_ref):
      enc_w0, enc_b0, ..., enc_w{n_enc-1}, enc_b{n_enc-1},
      ml_w, ml_b,
      dec_w0, dec_b0, ..., dec_w{n_dec-1}, dec_b{n_dec-1},
      recon_ref, mu_ref, logvar_ref

    Weights are pre-transposed (in, out) bf16; biases are (1, out) f32.
    Intermediate activations stay in VMEM (no HBM roundtrips).
    """
    n_params = 2 * (n_enc + 1 + n_dec)
    param_refs = refs[:n_params]
    recon_ref, mu_ref, logvar_ref = refs[n_params:]

    def linear(e, w_ref, b_ref, act):
        # MXU matmul with bf16 operands, f32 accumulation; bias/act in f32.
        y = jnp.dot(e.astype(w_ref.dtype), w_ref[...],
                    preferred_element_type=jnp.float32) + b_ref[...]
        if act == "relu":
            y = jnp.maximum(y, 0.0)
        elif act == "sigmoid":
            y = jax.nn.sigmoid(y)
        return y

    # ------------------------------ encoder ----------------------------------
    e = x_ref[...]
    idx = 0
    for _ in range(n_enc):
        e = linear(e, param_refs[idx], param_refs[idx + 1], "relu")
        idx += 2
    mu_logvar = linear(e, param_refs[idx], param_refs[idx + 1], "none")
    idx += 2

    # --------------------- reparameterise (torch.chunk order) ----------------
    mu = mu_logvar[:, :topic_num]
    logvar = mu_logvar[:, topic_num:]
    eps = eps_ref[...]                               # (B, topic_num) ~ N(0, 1)
    z = mu + eps * jnp.exp(logvar * 0.5)

    # ------------------------------ decoder ----------------------------------
    e = z
    for li in range(n_dec):
        act = "sigmoid" if li == n_dec - 1 else "relu"   # decoder_output_acf
        e = linear(e, param_refs[idx], param_refs[idx + 1], act)
        idx += 2

    recon_ref[...] = e.astype(recon_ref.dtype)
    mu_ref[...] = mu.astype(mu_ref.dtype)
    logvar_ref[...] = logvar.astype(logvar_ref.dtype)


# ------------------------------- parameters ----------------------------------

def init_linear_params(key, in_dim, out_dim, w_dtype=jnp.bfloat16):
    """torch.nn.Linear-style init; weight stored pre-transposed as (in, out)."""
    kw, kb = jax.random.split(key)
    bound = 1.0 / math.sqrt(in_dim)
    w = jax.random.uniform(kw, (in_dim, out_dim), jnp.float32, -bound, bound)
    b = jax.random.uniform(kb, (1, out_dim), jnp.float32, -bound, bound)
    return w.astype(w_dtype), b


def init_vae_params(key, inputdim, topic_num, encode_hidden_dims):
    encode_dims = [inputdim] + encode_hidden_dims
    # decode_hidden_dims == [] branch: decoder is the mirror of the encoder.
    decode_dims = [topic_num] + encode_dims[::-1]

    n_layers = (len(encode_dims) - 1) + 1 + (len(decode_dims) - 1)
    keys = jax.random.split(key, n_layers)
    ki = 0
    params = {"encoder_mlp": [], "decoder_mlp": []}
    for i in range(len(encode_dims) - 1):
        params["encoder_mlp"].append(
            init_linear_params(keys[ki], encode_dims[i], encode_dims[i + 1]))
        ki += 1
    params["encoder_mu_logvar"] = init_linear_params(
        keys[ki], encode_hidden_dims[-1], topic_num * 2)
    ki += 1
    for i in range(len(decode_dims) - 1):
        params["decoder_mlp"].append(
            init_linear_params(keys[ki], decode_dims[i], decode_dims[i + 1]))
        ki += 1
    return params


# ------------------------------ fused forward ---------------------------------

@functools.partial(jax.jit, static_argnames=("topic_num",))
def vae_forward(params, x, eps, *, topic_num):
    """Returns (recon_x, mu, logvar) — same semantics as VAE.forward."""
    n_enc = len(params["encoder_mlp"])
    n_dec = len(params["decoder_mlp"])
    B, inputdim = x.shape

    flat = []
    for (w, b) in params["encoder_mlp"]:
        flat += [w, b]
    flat += list(params["encoder_mu_logvar"])
    for (w, b) in params["decoder_mlp"]:
        flat += [w, b]

    vmem = pl.BlockSpec(memory_space=pltpu.MemorySpace.VMEM)

    kernel = functools.partial(
        _vae_fused_kernel, n_enc=n_enc, n_dec=n_dec, topic_num=topic_num)

    out_shapes = (
        jax.ShapeDtypeStruct((B, inputdim), jnp.float32),    # recon_x
        jax.ShapeDtypeStruct((B, topic_num), jnp.float32),   # mu
        jax.ShapeDtypeStruct((B, topic_num), jnp.float32),   # logvar
    )
    return pl.pallas_call(
        kernel,
        out_shape=out_shapes,
        in_specs=[vmem, vmem] + [vmem] * len(flat),
        out_specs=(vmem, vmem, vmem),
    )(x, eps, *flat)


# ----------------------------------- main --------------------------------------

if __name__ == "__main__":
    # Small shapes consistent with the module (scaled-down encode_hidden_dims).
    batch = 8
    inputdim = 32          # stands in for Config.vocLen
    topic_num = 4
    encode_hidden_dims = [64, 32]

    key = jax.random.PRNGKey(0)
    k_params, k_x, k_eps = jax.random.split(key, 3)

    params = init_vae_params(k_params, inputdim, topic_num, encode_hidden_dims)
    x = jax.random.uniform(k_x, (batch, inputdim), jnp.float32)
    # epsilon ~ N(0, 1), same role as torch.randn_like(mu) in reparameterise.
    eps = jax.random.normal(k_eps, (batch, topic_num), jnp.float32)

    recon_x, mu, logvar = vae_forward(params, x, eps, topic_num=topic_num)
    jax.block_until_ready((recon_x, mu, logvar))

    assert recon_x.shape == (batch, inputdim)
    assert mu.shape == (batch, topic_num)
    assert logvar.shape == (batch, topic_num)
    assert bool(jnp.all(jnp.isfinite(recon_x)))
    assert bool(jnp.all(jnp.isfinite(mu)))
    assert bool(jnp.all(jnp.isfinite(logvar)))
    # decoder output activation is sigmoid -> values in [0, 1]
    assert bool(jnp.all((recon_x >= 0.0) & (recon_x <= 1.0)))
    print("KERNEL_OK")
</pallas_src>

<mosaic_0001>
module attributes {stable_mosaic.version = 11 : i64} {
  func.func @_vae_fused_kernel(%arg0: memref<8x32xf32, #tpu.memory_space<vmem>>, %arg1: memref<8x4xf32, #tpu.memory_space<vmem>>, %arg2: memref<32x64xbf16, #tpu.memory_space<vmem>>, %arg3: memref<1x64xf32, #tpu.memory_space<vmem>>, %arg4: memref<64x32xbf16, #tpu.memory_space<vmem>>, %arg5: memref<1x32xf32, #tpu.memory_space<vmem>>, %arg6: memref<32x8xbf16, #tpu.memory_space<vmem>>, %arg7: memref<1x8xf32, #tpu.memory_space<vmem>>, %arg8: memref<4x32xbf16, #tpu.memory_space<vmem>>, %arg9: memref<1x32xf32, #tpu.memory_space<vmem>>, %arg10: memref<32x64xbf16, #tpu.memory_space<vmem>>, %arg11: memref<1x64xf32, #tpu.memory_space<vmem>>, %arg12: memref<64x32xbf16, #tpu.memory_space<vmem>>, %arg13: memref<1x32xf32, #tpu.memory_space<vmem>>, %arg14: memref<8x32xf32, #tpu.memory_space<vmem>>, %arg15: memref<8x4xf32, #tpu.memory_space<vmem>>, %arg16: memref<8x4xf32, #tpu.memory_space<vmem>>) attributes {dimension_semantics = [], scalar_prefetch = 0 : i64, scratch_operands = 0 : i64, tpu.core_type = #tpu.core_type<tc>} {
    %c0 = arith.constant 0 : index
    %c0_0 = arith.constant 0 : index
    %0 = vector.load %arg0[%c0, %c0_0] : memref<8x32xf32, #tpu.memory_space<vmem>>, vector<8x32xf32>
    %1 = arith.truncf %0 : vector<8x32xf32> to vector<8x32xbf16>
    %c0_1 = arith.constant 0 : index
    %c0_2 = arith.constant 0 : index
    %2 = vector.load %arg2[%c0_1, %c0_2] : memref<32x64xbf16, #tpu.memory_space<vmem>>, vector<32x64xbf16>
    %cst = arith.constant dense<0.000000e+00> : vector<8x64xf32>
    %3 = tpu.matmul %1, %2, %cst {dimension_numbers = #tpu.dot_dimension_numbers<[1], [0], [0], [1], [0, 0, 1, 1], [], []>} : vector<8x32xbf16>, vector<32x64xbf16>, vector<8x64xf32> -> vector<8x64xf32>
    %c0_3 = arith.constant 0 : index
    %c0_4 = arith.constant 0 : index
    %4 = vector.load %arg3[%c0_3, %c0_4] : memref<1x64xf32, #tpu.memory_space<vmem>>, vector<1x64xf32>
    %5 = vector.broadcast %4 : vector<1x64xf32> to vector<8x64xf32>
    %6 = arith.addf %3, %5 : vector<8x64xf32>
    %cst_5 = arith.constant 0.000000e+00 : f32
    %7 = vector.broadcast %cst_5 : f32 to vector<8x64xf32>
    %8 = arith.maximumf %6, %7 : vector<8x64xf32>
    %9 = arith.truncf %8 : vector<8x64xf32> to vector<8x64xbf16>
    %c0_6 = arith.constant 0 : index
    %c0_7 = arith.constant 0 : index
    %10 = vector.load %arg4[%c0_6, %c0_7] : memref<64x32xbf16, #tpu.memory_space<vmem>>, vector<64x32xbf16>
    %cst_8 = arith.constant dense<0.000000e+00> : vector<8x32xf32>
    %11 = tpu.matmul %9, %10, %cst_8 {dimension_numbers = #tpu.dot_dimension_numbers<[1], [0], [0], [1], [0, 0, 1, 1], [], []>} : vector<8x64xbf16>, vector<64x32xbf16>, vector<8x32xf32> -> vector<8x32xf32>
    %c0_9 = arith.constant 0 : index
    %c0_10 = arith.constant 0 : index
    %12 = vector.load %arg5[%c0_9, %c0_10] : memref<1x32xf32, #tpu.memory_space<vmem>>, vector<1x32xf32>
    %13 = vector.broadcast %12 : vector<1x32xf32> to vector<8x32xf32>
    %14 = arith.addf %11, %13 : vector<8x32xf32>
    %cst_11 = arith.constant 0.000000e+00 : f32
    %15 = vector.broadcast %cst_11 : f32 to vector<8x32xf32>
    %16 = arith.maximumf %14, %15 : vector<8x32xf32>
    %17 = arith.truncf %16 : vector<8x32xf32> to vector<8x32xbf16>
    %c0_12 = arith.constant 0 : index
    %c0_13 = arith.constant 0 : index
    %18 = vector.load %arg6[%c0_12, %c0_13] : memref<32x8xbf16, #tpu.memory_space<vmem>>, vector<32x8xbf16>
    %cst_14 = arith.constant dense<0.000000e+00> : vector<8x8xf32>
    %19 = tpu.matmul %17, %18, %cst_14 {dimension_numbers = #tpu.dot_dimension_numbers<[1], [0], [0], [1], [0, 0, 1, 1], [], []>} : vector<8x32xbf16>, vector<32x8xbf16>, vector<8x8xf32> -> vector<8x8xf32>
    %c0_15 = arith.constant 0 : index
    %c0_16 = arith.constant 0 : index
    %20 = vector.load %arg7[%c0_15, %c0_16] : memref<1x8xf32, #tpu.memory_space<vmem>>, vector<1x8xf32>
    %21 = vector.broadcast %20 : vector<1x8xf32> to vector<8x8xf32>
    %22 = arith.addf %19, %21 : vector<8x8xf32>
    %23 = vector.extract_strided_slice %22 {offsets = [0, 0], sizes = [8, 4], strides = [1, 1]} : vector<8x8xf32> to vector<8x4xf32>
    %24 = vector.extract_strided_slice %22 {offsets = [0, 4], sizes = [8, 4], strides = [1, 1]} : vector<8x8xf32> to vector<8x4xf32>
    %c0_17 = arith.constant 0 : index
    %c0_18 = arith.constant 0 : index
    %25 = vector.load %arg1[%c0_17, %c0_18] : memref<8x4xf32, #tpu.memory_space<vmem>>, vector<8x4xf32>
    %cst_19 = arith.constant 5.000000e-01 : f32
    %26 = vector.broadcast %cst_19 : f32 to vector<8x4xf32>
    %27 = arith.mulf %24, %26 : vector<8x4xf32>
    %28 = math.exp %27 : vector<8x4xf32>
    %29 = arith.mulf %25, %28 : vector<8x4xf32>
    %30 = arith.addf %23, %29 : vector<8x4xf32>
    %31 = arith.truncf %30 : vector<8x4xf32> to vector<8x4xbf16>
    %c0_20 = arith.constant 0 : index
    %c0_21 = arith.constant 0 : index
    %32 = vector.load %arg8[%c0_20, %c0_21] : memref<4x32xbf16, #tpu.memory_space<vmem>>, vector<4x32xbf16>
    %cst_22 = arith.constant dense<0.000000e+00> : vector<8x32xf32>
    %33 = tpu.matmul %31, %32, %cst_22 {dimension_numbers = #tpu.dot_dimension_numbers<[1], [0], [0], [1], [0, 0, 1, 1], [], []>} : vector<8x4xbf16>, vector<4x32xbf16>, vector<8x32xf32> -> vector<8x32xf32>
    %c0_23 = arith.constant 0 : index
    %c0_24 = arith.constant 0 : index
    %34 = vector.load %arg9[%c0_23, %c0_24] : memref<1x32xf32, #tpu.memory_space<vmem>>, vector<1x32xf32>
    %35 = vector.broadcast %34 : vector<1x32xf32> to vector<8x32xf32>
    %36 = arith.addf %33, %35 : vector<8x32xf32>
    %cst_25 = arith.constant 0.000000e+00 : f32
    %37 = vector.broadcast %cst_25 : f32 to vector<8x32xf32>
    %38 = arith.maximumf %36, %37 : vector<8x32xf32>
    %39 = arith.truncf %38 : vector<8x32xf32> to vector<8x32xbf16>
    %c0_26 = arith.constant 0 : index
    %c0_27 = arith.constant 0 : index
    %40 = vector.load %arg10[%c0_26, %c0_27] : memref<32x64xbf16, #tpu.memory_space<vmem>>, vector<32x64xbf16>
    %cst_28 = arith.constant dense<0.000000e+00> : vector<8x64xf32>
    %41 = tpu.matmul %39, %40, %cst_28 {dimension_numbers = #tpu.dot_dimension_numbers<[1], [0], [0], [1], [0, 0, 1, 1], [], []>} : vector<8x32xbf16>, vector<32x64xbf16>, vector<8x64xf32> -> vector<8x64xf32>
    %c0_29 = arith.constant 0 : index
    %c0_30 = arith.constant 0 : index
    %42 = vector.load %arg11[%c0_29, %c0_30] : memref<1x64xf32, #tpu.memory_space<vmem>>, vector<1x64xf32>
    %43 = vector.broadcast %42 : vector<1x64xf32> to vector<8x64xf32>
    %44 = arith.addf %41, %43 : vector<8x64xf32>
    %cst_31 = arith.constant 0.000000e+00 : f32
    %45 = vector.broadcast %cst_31 : f32 to vector<8x64xf32>
    %46 = arith.maximumf %44, %45 : vector<8x64xf32>
    %47 = arith.truncf %46 : vector<8x64xf32> to vector<8x64xbf16>
    %c0_32 = arith.constant 0 : index
    %c0_33 = arith.constant 0 : index
    %48 = vector.load %arg12[%c0_32, %c0_33] : memref<64x32xbf16, #tpu.memory_space<vmem>>, vector<64x32xbf16>
    %cst_34 = arith.constant dense<0.000000e+00> : vector<8x32xf32>
    %49 = tpu.matmul %47, %48, %cst_34 {dimension_numbers = #tpu.dot_dimension_numbers<[1], [0], [0], [1], [0, 0, 1, 1], [], []>} : vector<8x64xbf16>, vector<64x32xbf16>, vector<8x32xf32> -> vector<8x32xf32>
    %c0_35 = arith.constant 0 : index
    %c0_36 = arith.constant 0 : index
    %50 = vector.load %arg13[%c0_35, %c0_36] : memref<1x32xf32, #tpu.memory_space<vmem>>, vector<1x32xf32>
    %51 = vector.broadcast %50 : vector<1x32xf32> to vector<8x32xf32>
    %52 = arith.addf %49, %51 : vector<8x32xf32>
    %53 = arith.negf %52 : vector<8x32xf32>
    %54 = math.exp %53 : vector<8x32xf32>
    %cst_37 = arith.constant 1.000000e+00 : f32
    %55 = vector.broadcast %cst_37 : f32 to vector<8x32xf32>
    %56 = arith.addf %55, %54 : vector<8x32xf32>
    %57 = arith.divf %55, %56 : vector<8x32xf32>
    %c0_38 = arith.constant 0 : index
    %c0_39 = arith.constant 0 : index
    %58 = vector.load %arg14[%c0_38, %c0_39] : memref<8x32xf32, #tpu.memory_space<vmem>>, vector<8x32xf32>
    tpu.vector_store %arg14[%c0_38, %c0_39], %57 {strides = array<i32>} : memref<8x32xf32, #tpu.memory_space<vmem>>, vector<8x32xf32>,
    %c0_40 = arith.constant 0 : index
    %c0_41 = arith.constant 0 : index
    %59 = vector.load %arg15[%c0_40, %c0_41] : memref<8x4xf32, #tpu.memory_space<vmem>>, vector<8x4xf32>
    tpu.vector_store %arg15[%c0_40, %c0_41], %23 {strides = array<i32>} : memref<8x4xf32, #tpu.memory_space<vmem>>, vector<8x4xf32>,
    %c0_42 = arith.constant 0 : index
    %c0_43 = arith.constant 0 : index
    %60 = vector.load %arg16[%c0_42, %c0_43] : memref<8x4xf32, #tpu.memory_space<vmem>>, vector<8x4xf32>
    tpu.vector_store %arg16[%c0_42, %c0_43], %24 {strides = array<i32>} : memref<8x4xf32, #tpu.memory_space<vmem>>, vector<8x4xf32>,
    return
  }
}

</mosaic_0001>

<bundles_post_ra>
// kernel: vae_forward.1
= control target key start
LH: loop header
LB: loop body
LE: loop exit
PB: predicated region body
PF: predicated region fallthrough
CT: control target
= control target key end

     0   :  { %s879_s0 = inlined_call_operand.vmem [shape: f32[8,32], index: 0, kind: input, shape index: {}]   ;;  %s880_s1 = inlined_call_operand.vmem [shape: f32[8,4], index: 1, kind: input, shape index: {}]   ;;  %s881_s2 = inlined_call_operand.vmem [shape: bf16[32,64], index: 2, kind: input, shape index: {}]   ;;  %s882_s3 = inlined_call_operand.vmem [shape: f32[1,64], index: 3, kind: input, shape index: {}]   ;;  %s883_s4 = inlined_call_operand.vmem [shape: bf16[64,32], index: 4, kind: input, shape index: {}]   ;;  %s884_s5 = inlined_call_operand.vmem [shape: f32[1,32], index: 5, kind: input, shape index: {}]   ;;  %s885_s6 = inlined_call_operand.vmem [shape: bf16[32,8], index: 6, kind: input, shape index: {}]   ;;  %s886_s7 = inlined_call_operand.vmem [shape: f32[1,8], index: 7, kind: input, shape index: {}]   ;;  %s887_s8 = inlined_call_operand.vmem [shape: bf16[4,32], index: 8, kind: input, shape index: {}]   ;;  %s888_s9 = inlined_call_operand.vmem [shape: f32[1,32], index: 9, kind: input, shape index: {}]   ;;  %s889_s10 = inlined_call_operand.vmem [shape: bf16[32,64], index: 10, kind: input, shape index: {}]   ;;  %s890_s11 = inlined_call_operand.vmem [shape: f32[1,64], index: 11, kind: input, shape index: {}]   ;;  %s891_s12 = inlined_call_operand.vmem [shape: bf16[64,32], index: 12, kind: input, shape index: {}]   ;;  %s892_s13 = inlined_call_operand.vmem [shape: f32[1,32], index: 13, kind: input, shape index: {}]   ;;  %s893_s14 = inlined_call_operand.hbm [shape: f32[8,32], index: 14, kind: output, shape index: {0}]   ;;  %s894_s15 = inlined_call_operand.vmem [shape: f32[8,4], index: 15, kind: output, shape index: {1}]   ;;  %s895_s16 = inlined_call_operand.vmem [shape: f32[8,4], index: 16, kind: output, shape index: {2}]  }
   0x1   :  { %896 = sst [smem:[#allocation5_spill]] %s879_s0 }
   0x2   :  { %v634_v0 = vld [vmem:[%s881_s2 + $0x8] sm:$0xff]   ;;  %v676_v1 = vmov 0.0   ;;  %v635_v2 = vld [vmem:[%s881_s2] sm:$0xff]   ;;  %vm677_vm0 = vmmov 0   ;;  %s897_s27 = sld [smem:[#allocation5_spill]]  ;;  %vm77_vm1 = vcmask 261120  }
   0x3   :  { %576 = vmatprep.subr.bf16.mxu1 %v676_v1  ;;  %596 = vmatprep.subr.bf16.mxu0 %v676_v1  ;;  %v636_v4 = vld [vmem:[%s883_s4 + $0x18] sm:$0xff]   ;;  %v637_v6 = vld [vmem:[%s883_s4 + $0x10] sm:$0xff]  }
   0x4   :  { %577 = vmatpush3.bf16.msra.mxu1 %v634_v0  ;;  %580 = vmatprep.mubr.msk.bf16.mxu1 %vm677_vm0, %v676_v1 }
   0x5   :  { %578 = vmatprep.subr.bf16.mxu1 %v676_v1  ;;  %600 = vmatprep.mubr.msk.bf16.mxu0 %vm677_vm0, %v676_v1 }
   0x8   :  { %v52_v3 = vld [vmem:[%s897_s27] sm:$0xff]  ;;  %579 = vmatpush3.bf16.msra.mxu1 %v635_v2 }
   0x9   :  { %v53_v5 = vpack.c.bf16 %v52_v3, %v52_v3  ;;  %584 = vmatprep.subr.bf16.mxu1 %v676_v1 }
   0xb   :  { %581 = vmatmul.mubr.msk.bf16.vlgmr.msra.gmra.mxu1 %vm77_vm1, %v53_v5 }
   0xc   :  { %585 = vmatpush3.bf16.msra.mxu1 %v636_v4  ;;  %592 = vmatprep.mubr.msk.bf16.mxu1 %vm677_vm0, %v676_v1 }
   0xd   :  { %586 = vmatprep.subr.bf16.mxu1 %v676_v1 }
   0xe   :  { %22 = vsyncpa [#allocation3], 0  ;;  %v638_v7 = vld [vmem:[%s883_s4 + $0x8] sm:$0xff]   ;;  %v639_v8 = vld [vmem:[%s883_s4] sm:$0xff]   ;;  %vm162_vm2 = vcmask 523264   ;;  %vm297_vm3 = vcmask 1041408  }
   0xf   :  { %v528_v9 = vld [vmem:[%s882_s3] ss:$0 sm:$0xff]  ;;  %v640_v17 = vld [vmem:[%s885_s6 + $0x8] sm:$0xff]   ;;  %vm293_vm4 = vcmask 31744   ;;  %v644_v46 = vld [vmem:[%s891_s12 + $0x18] sm:$0xff]  }
  0x10   :  { %587 = vmatpush3.bf16.msra.mxu1 %v637_v6  ;;  %597 = vmatpush3.bf16.msra.mxu0 %v640_v17  ;;  %v641_v18 = vld [vmem:[%s885_s6] sm:$0xff]   ;;  %v642_v37 = vld [vmem:[%s889_s10 + $0x8] sm:$0xff]   ;;  %v645_v47 = vld [vmem:[%s891_s12 + $0x10] sm:$0xff]  }
  0x11   :  { %588 = vmatprep.subr.bf16.mxu1 %v676_v1  ;;  %598 = vmatprep.subr.bf16.mxu0 %v676_v1  ;;  %v532_v19 = vld [vmem:[%s884_s5] ss:$0 sm:$0xff]  ;;  %v646_v56 = vld [vmem:[%s891_s12 + $0x8] sm:$0xff]  }
  0x12   :  { %v285_v27 = vld [vmem:[%s887_s8] sm:$0x3] }
  0x13   :  { %v299_v28 = vsel %vm297_vm3, %v285_v27, 0  ;;  %v538_v29 = vld [vmem:[%s886_s7] ss:$0 sm:$0xff]  ;;  %s678_s7 = smov 124  }
  0x14   :  { %589 = vmatpush3.bf16.msra.mxu1 %v638_v7  ;;  %599 = vmatpush3.bf16.msra.mxu0 %v641_v18  ;;  %v274_v39 = vld [vmem:[%s880_s1] sm:$0xff] }
  0x15   :  { %590 = vmatprep.subr.bf16.mxu1 %v676_v1  ;;  %604 = vmatprep.subr.bf16.mxu0 %v676_v1  ;;  %v643_v45 = vld [vmem:[%s889_s10] sm:$0xff]  }
  0x16   :  { %v542_v48 = vld [vmem:[%s888_s9] ss:$0 sm:$0xff] }
  0x17   :  { %v647_v57 = vld [vmem:[%s891_s12] sm:$0xff]  }
  0x18   :  { %591 = vmatpush3.bf16.msra.mxu1 %v639_v8  ;;  %v544_v58 = vld [vmem:[%s890_s11] ss:$0 sm:$0xff]  ;;  %s679_s11 = smov [#allocation2]  }
  0x19   :  { %610 = vmatprep.subr.bf16.mxu1 %v676_v1  ;;  %s512_s12 = sshll.u32 %s679_s11, 4  ;;  %s513_s12 = int_to_ptr.vmem [resolvable:$true] %s512_s12 }
  0x1a   :  { %s654_s5 = scalar_lea.vmem %s513_s12, 128  ;;  %p659_p1 = scmp.lt.s32.totalorder %s513_s12, %s513_s12 }
  0x1b   :  { %p655_p0 = scmp.ne.s32.totalorder %s513_s12, %s654_s5  ;;  %p660_p2 = scmp.lt.s32.totalorder %s654_s5, %s654_s5 }
  0x1d   :  { %p661_p3 = por %p660_p2, %p659_p1 }
  0x1f   :  { %p662_p4 = pnand %p661_p3, %p655_p0 }
  0xcb   :  { %v115_v10 = vpop.f32.mrf.mxu1 }
  0xcc   :  { %v116_v11 = vadd.f32 %v528_v9, %v115_v10 }
  0xcd   :  { %v582_v12 = vpop.f32.mrf.mxu1 }
  0xce   :  { %v121_v13 = vmax.f32 %v116_v11, 0.0 }
  0xcf   :  { %v118_v14 = vpop.f32.mrf.mxu1 }
  0xd0   :  { %v122_v15 = vpack.c.bf16 %v121_v13, %v121_v13 }
  0xd1   :  { %v583_v16 = vpop.f32.mrf.mxu1 }
  0xd2   :  { %593 = vmatmul.mubr.msk.bf16.vlgmr.msra.gmra.mxu1 %vm162_vm2, %v122_v15 }
  0xd3   :  { %614 = vmatprep.mubr.msk.bf16.mxu1 %vm677_vm0, %v676_v1  ;;  %611 = vmatpush3.bf16.msra.mxu1 %v642_v37 }
  0xd4   :  { %612 = vmatprep.subr.bf16.mxu1 %v676_v1 }
  0xd7   :  { %613 = vmatpush3.bf16.msra.mxu1 %v643_v45 }
 0x192   :  { %v200_v20 = vpop.f32.mrf.mxu1 }
 0x193   :  { %v201_v21 = vadd.f32 %v532_v19, %v200_v20 }
 0x194   :  { %v594_v22 = vpop.f32.mrf.mxu1 }
 0x195   :  { %v206_v23 = vmax.f32 %v201_v21, 0.0 }
 0x196   :  { %v203_v24 = vpop.f32.mrf.mxu1 }
 0x197   :  { %v207_v25 = vpack.c.bf16 %v206_v23, %v206_v23 }
 0x198   :  { %v595_v26 = vpop.f32.mrf.mxu1 }
 0x199   :  { %601 = vmatmul.mubr.msk.bf16.vlgmr.msra.gmra.mxu0 %vm77_vm1, %v207_v25 }
 0x19a   :  { %606 = vmatprep.mubr.msk.bf16.mxu0 %vm677_vm0, %v676_v1  ;;  %605 = vmatpush3.bf16.msra.mxu0 %v299_v28 }
 0x19b   :  { %618 = vmatprep.subr.bf16.mxu0 %v676_v1 }
 0x259   :  { %v268_v30 = vpop.f32.mrf.mxu0 }
 0x25a   :  { %v269_v31 = vadd.f32 %v538_v29, %v268_v30 }
 0x25b   :  { %v602_v32 = vpop.f32.mrf.mxu0 }
 0x25c   :  { %v275_v33 = vmul.f32 0.5, %v269_v31  ;;  %500 = vst.msk [vmem:[%s894_s15] sm:$0xff] %vm293_vm4, %v269_v31 }
 0x25d   :  { %v271_v34 = vpop.f32.mrf.mxu0 }
 0x25e   :  { %v276_v35 = vmul.f32 1.442695, %v275_v33 }
 0x25f   :  { %v603_v36 = vpop.f32.mrf.mxu0 }
 0x260   :  { %648 = vpow2.f32 %v276_v35 }
 0x26d   :  { %v649_v38 = vpop.eup %648 }
 0x26e   :  { %279 = vrot.lane.b32.xlu0 %v649_v38, %s678_s7 }
 0x272   :  { %502 = vrot.lane.b32.xlu0 %v269_v31, %s678_s7 }
 0x2e0   :  { %v280_v40 = vpop.permute.xlu0 %279 }
 0x2e1   :  { %v282_v41 = vmul.f32 %v280_v40, %v274_v39 }
 0x2e3   :  { %v283_v42 = vadd.f32 %v282_v41, %v269_v31 }
 0x2e4   :  { %v503_v43 = vpop.permute.xlu0 %502 }
 0x2e5   :  { %v284_v44 = vpack.c.bf16 %v283_v42, %v283_v42  ;;  %505 = vst.msk [vmem:[%s895_s16] sm:$0xff] %vm293_vm4, %v503_v43 }
 0x2e7   :  { %607 = vmatmul.mubr.msk.bf16.vlgmr.msra.gmra.mxu0 %vm293_vm4, %v284_v44 }
 0x2e8   :  { %626 = vmatprep.mubr.msk.bf16.mxu0 %vm677_vm0, %v676_v1  ;;  %619 = vmatpush3.bf16.msra.mxu0 %v644_v46 }
 0x2e9   :  { %620 = vmatprep.subr.bf16.mxu0 %v676_v1 }
 0x2ec   :  { %621 = vmatpush3.bf16.msra.mxu0 %v645_v47 }
 0x2ed   :  { %622 = vmatprep.subr.bf16.mxu0 %v676_v1 }
 0x2f0   :  { %623 = vmatpush3.bf16.msra.mxu0 %v646_v56 }
 0x2f1   :  { %624 = vmatprep.subr.bf16.mxu0 %v676_v1  ;;  %v548_v1 = vld [vmem:[%s892_s13] ss:$0 sm:$0xff] }
 0x2f4   :  { %625 = vmatpush3.bf16.msra.mxu0 %v647_v57 }
 0x3a7   :  { %v335_v49 = vpop.f32.mrf.mxu0 }
 0x3a8   :  { %v336_v50 = vadd.f32 %v542_v48, %v335_v49 }
 0x3a9   :  { %v608_v51 = vpop.f32.mrf.mxu0 }
 0x3aa   :  { %v341_v52 = vmax.f32 %v336_v50, 0.0 }
 0x3ab   :  { %v338_v53 = vpop.f32.mrf.mxu0 }
 0x3ac   :  { %v342_v54 = vpack.c.bf16 %v341_v52, %v341_v52 }
 0x3ad   :  { %v609_v55 = vpop.f32.mrf.mxu0 }
 0x3ae   :  { %615 = vmatmul.mubr.msk.bf16.vlgmr.msra.gmra.mxu1 %vm77_vm1, %v342_v54 }
 0x46e   :  { %v403_v59 = vpop.f32.mrf.mxu1 }
 0x46f   :  { %v404_v60 = vadd.f32 %v544_v58, %v403_v59 }
 0x470   :  { %v616_v61 = vpop.f32.mrf.mxu1 }
 0x471   :  { %v409_v62 = vmax.f32 %v404_v60, 0.0 }
 0x472   :  { %v406_v63 = vpop.f32.mrf.mxu1 }
 0x473   :  { %v410_v0 = vpack.c.bf16 %v409_v62, %v409_v62 }
 0x474   :  { %v617_v2 = vpop.f32.mrf.mxu1 }
 0x475   :  { %627 = vmatmul.mubr.msk.bf16.vlgmr.msra.gmra.mxu0 %vm162_vm2, %v410_v0 }
 0x535   :  { %v487_v3 = vpop.f32.mrf.mxu0 }
 0x536   :  { %v488_v4 = vadd.f32 %v548_v1, %v487_v3 }
 0x537   :  { %v628_v5 = vpop.f32.mrf.mxu0 }
 0x538   :  { %v554_v6 = vmul.f32 -1.442695, %v488_v4 }
 0x539   :  { %v490_v7 = vpop.f32.mrf.mxu0 }
 0x53a   :  { %650 = vpow2.f32 %v554_v6 }
 0x53b   :  { %v629_v8 = vpop.f32.mrf.mxu0 }
 0x547   :  { %v651_v9 = vpop.eup %650 }
 0x548   :  { %v496_v10 = vadd.f32 1.0, %v651_v9 }
 0x54a   :  { %652 = vrcp.f32 %v496_v10 }
 0x557   :  { %v653_v11 = vpop.eup %652 }
 0x558   :  { %499 = vst.msk [vmem:[#allocation2] sm:$0xff] %vm77_vm1, %v653_v11 }
 0x559   :  { %665 = shalt.err (!%p662_p4)
}
 0x55a   :  { %515 = dma.vmem_to_hbm [thread:$0]  %s513_s12, 128, %s893_s14, [#allocation3]  }
 0x55b   :  { %674 = dma.done.wait [#allocation3], 128  }
 0x55c   :  { %675 = vsyncadd [#allocation3], 4294967168 }
 0x55d   :  { %527 = vsyncpa [#allocation3], 1 }

</bundles_post_ra>
